<compile_context>
chip_gen: v7x
topology: tpu7x:2x2x1
jax: 0.10.0
libtpu: 0.0.40
codegen_flags: <defaults>
</compile_context>

<pallas_src>
import jax
import jax.numpy as jnp
from jax.experimental import pallas as pl
from jax.experimental.pallas import tpu as pltpu

# --- SkewProduct configuration (small synthetic sizes) ----------------------
Z_DIMS_AUTON = (8, 8)      # z_dim of each autonomous transition model
FREE_TARGET = 16           # free_target_dims = target.z_dim - sum(Z_DIMS_AUTON)
SUB_TOTAL = sum(Z_DIMS_AUTON)
Z_DIM = SUB_TOTAL + FREE_TARGET            # total (and target model) z_dim = 32
HIDDEN = 32                # MLP hidden width
NUM_AUTON = len(Z_DIMS_AUTON)
NH = NUM_AUTON * HIDDEN    # fused hidden width of block-diagonal MLP = 64

TB = 8                     # batch tile (sublane count; bias block replicated to TB rows)
BATCH = 64                 # demo batch: grid of 8 tiles, slab stays VMEM-resident

# --- packed bf16 parameter slab layout ---------------------------------------
# rows 0:32,  lanes 0:96   : W1CAT = [w1bd | tw1f]           (Z_DIM, NH+HIDDEN)
# rows 0:32,  lanes 96:112 : TW2F  = tw2[:, -FREE:]          (HIDDEN, FREE)
# rows 32:96, lanes 0:48   : W2CAT = [w2bd | w2bd@tw1s]      (NH, SUB+HIDDEN)
# rows 96:104, lanes 0:128 : BIAS  = [b1c | bias_fold | b2c | tb2f], rep. x TB
R_W1CAT = 0
R_W2CAT = 32
R_BIAS = 96
SLAB_ROWS = 104
SLAB_LANES = 128
C_TW2F = NH + HIDDEN       # 96
C_BOUT = 96                # bias lanes 96:128 = [b2c | tb2f]


# --- the kernel --------------------------------------------------------------
def _skew_kernel(z_ref, p_ref, out_ref):
    z = z_ref[...].astype(jnp.bfloat16)                                 # (TB, 32)

    # static slices of the single VMEM parameter slab (bf16)
    w1cat = p_ref[R_W1CAT:R_W1CAT + Z_DIM, 0:NH + HIDDEN]               # (32, 96)
    tw2f = p_ref[R_W1CAT:R_W1CAT + HIDDEN, C_TW2F:C_TW2F + FREE_TARGET]  # (32, 16)
    w2cat = p_ref[R_W2CAT:R_W2CAT + NH, 0:SUB_TOTAL + HIDDEN]           # (64, 48)
    bias = p_ref[R_BIAS:R_BIAS + TB, :].astype(jnp.float32)             # (TB, 128)

    # MXU pass 1: z @ [w1bd | tw1f]; lanes 0:64 -> h_pre, lanes 64:96 -> z@tw1f.
    # One VPU add covers both b1c (lanes 0:64) and folded bias (lanes 64:96).
    c1 = jnp.dot(z, w1cat, preferred_element_type=jnp.float32) \
        + bias[:, 0:NH + HIDDEN]                                        # (TB, 96)
    h = jnp.tanh(c1[:, 0:NH]).astype(jnp.bfloat16)                      # (TB, 64)

    # MXU pass 2: h @ [w2bd | w2bd@tw1s]; lanes 0:16 -> sub_new (pre-bias),
    # lanes 16:48 -> h @ W2T1 (target hidden pre-activation minus z@tw1f part).
    c2 = jnp.dot(h, w2cat, preferred_element_type=jnp.float32)          # (TB, 48)
    ht = jnp.tanh(c2[:, SUB_TOTAL:SUB_TOTAL + HIDDEN]
                  + c1[:, NH:NH + HIDDEN]).astype(jnp.bfloat16)         # (TB, 32)

    # MXU pass 3: only the free-target output columns of the target model.
    nf = jnp.dot(ht, tw2f, preferred_element_type=jnp.float32)          # (TB, 16)

    # final_z = [sub_new | new_free]: lane-concat + one bias add + one store.
    out = jnp.concatenate([c2[:, 0:SUB_TOTAL], nf], axis=-1) \
        + bias[:, C_BOUT:C_BOUT + Z_DIM]                                # (TB, 32)
    out_ref[...] = out


# --- host-side parameter packing (done once; parameters are static) ----------
def pack_params(auton_params, target_params):
    """Pack all parameters into one (SLAB_ROWS, 128) bf16 slab."""
    f32 = jnp.float32

    # block-diagonal fused autonomous MLP weights (zero-padded over full z)
    w1bd = jnp.zeros((Z_DIM, NH), f32)
    b1c = jnp.zeros((1, NH), f32)
    w2bd = jnp.zeros((NH, SUB_TOTAL), f32)
    b2c = jnp.zeros((1, SUB_TOTAL), f32)
    off = 0
    for i, (d, (w1, b1, w2, b2)) in enumerate(zip(Z_DIMS_AUTON, auton_params)):
        c0, c1 = i * HIDDEN, (i + 1) * HIDDEN
        w1bd = w1bd.at[off:off + d, c0:c1].set(w1)
        b1c = b1c.at[:, c0:c1].set(b1)
        w2bd = w2bd.at[c0:c1, off:off + d].set(w2)
        b2c = b2c.at[:, off:off + d].set(b2)
        off += d

    # split / slice target MLP weights
    tw1, tb1, tw2, tb2 = target_params
    tw1s = tw1[:SUB_TOTAL]                                              # (SUB, H)
    tw1f = jnp.zeros((Z_DIM, HIDDEN), f32).at[SUB_TOTAL:].set(tw1[SUB_TOTAL:])
    tw2f = tw2[:, -FREE_TARGET:]                                        # (H, FREE)
    tb2f = tb2[:, -FREE_TARGET:]                                        # (1, FREE)

    # fold the sub_new -> target-hidden matmul into the weights (exact f32)
    hi = jax.lax.Precision.HIGHEST
    w2t1 = jnp.dot(w2bd, tw1s, precision=hi)                            # (NH, H)
    bias_fold = jnp.dot(b2c, tw1s, precision=hi) + tb1                  # (1, H)

    # lane-concatenated weight blocks sharing the same LHS
    w1cat = jnp.concatenate([w1bd, tw1f], axis=1)                       # (32, 96)
    w2cat = jnp.concatenate([w2bd, w2t1], axis=1)                       # (64, 48)

    # all biases in one (TB, 128) sublane-replicated block
    bias_row = jnp.concatenate([b1c, bias_fold, b2c, tb2f], axis=1)     # (1, 128)
    bias_rep = jnp.tile(bias_row, (TB, 1))                              # (TB, 128)

    slab = jnp.zeros((SLAB_ROWS, SLAB_LANES), f32)
    slab = slab.at[R_W1CAT:R_W1CAT + Z_DIM, 0:NH + HIDDEN].set(w1cat)
    slab = slab.at[R_W1CAT:R_W1CAT + HIDDEN, C_TW2F:C_TW2F + FREE_TARGET].set(tw2f)
    slab = slab.at[R_W2CAT:R_W2CAT + NH, 0:SUB_TOTAL + HIDDEN].set(w2cat)
    slab = slab.at[R_BIAS:R_BIAS + TB, :].set(bias_rep)
    return slab.astype(jnp.bfloat16)


# --- wrapper ------------------------------------------------------------------
def skew_product_forward(z, param_slab):
    """z: (B, Z_DIM) f32 with B % TB == 0; param_slab: (104,128) bf16 slab."""
    B, Zt = z.shape
    assert Zt == Z_DIM and B % TB == 0
    return pl.pallas_call(
        _skew_kernel,
        grid=(B // TB,),
        in_specs=[
            pl.BlockSpec((TB, Z_DIM), lambda i: (i, 0)),
            # constant block index -> slab DMA'd once, VMEM-resident across steps
            pl.BlockSpec((SLAB_ROWS, SLAB_LANES), lambda i: (0, 0)),
        ],
        out_specs=pl.BlockSpec((TB, Z_DIM), lambda i: (i, 0)),
        out_shape=jax.ShapeDtypeStruct((B, Z_DIM), jnp.float32),
        compiler_params=pltpu.CompilerParams(
            dimension_semantics=("parallel",)),   # v7x: shard tiles over 2 TCs
    )(z, param_slab)


# --- deterministic parameter init (PyTorch nn.Linear-style uniform) ----------
def init_mlp(key, d_in, hidden, d_out):
    k1, k2, k3, k4 = jax.random.split(key, 4)
    s1 = 1.0 / jnp.sqrt(jnp.float32(d_in))
    s2 = 1.0 / jnp.sqrt(jnp.float32(hidden))
    w1 = jax.random.uniform(k1, (d_in, hidden), jnp.float32, -s1, s1)
    b1 = jax.random.uniform(k2, (1, hidden), jnp.float32, -s1, s1)
    w2 = jax.random.uniform(k3, (hidden, d_out), jnp.float32, -s2, s2)
    b2 = jax.random.uniform(k4, (1, d_out), jnp.float32, -s2, s2)
    return (w1, b1, w2, b2)


# --- pure-JAX reference (mirrors the PyTorch forward, unfused, f32) -----------
def _mlp(x, w1, b1, w2, b2):
    h = jnp.tanh(jnp.dot(x, w1, preferred_element_type=jnp.float32) + b1)
    return jnp.dot(h, w2, preferred_element_type=jnp.float32) + b2


def reference_forward(z, auton_params, target_params):
    pieces = []
    off = 0
    for d, prm in zip(Z_DIMS_AUTON, auton_params):
        pieces.append(_mlp(z[:, off:off + d], *prm))
        off += d
    sub_new = jnp.concatenate(pieces, axis=-1)
    updated = jnp.concatenate([sub_new, z[:, SUB_TOTAL:]], axis=-1)
    new_z = _mlp(updated, *target_params)
    return jnp.concatenate([sub_new, new_z[:, -FREE_TARGET:]], axis=-1)


if __name__ == "__main__":
    key = jax.random.PRNGKey(0)
    kz, *mkeys = jax.random.split(key, 2 + len(Z_DIMS_AUTON))

    z = jax.random.normal(kz, (BATCH, Z_DIM), jnp.float32)
    auton_params = [init_mlp(mkeys[i], d, HIDDEN, d)
                    for i, d in enumerate(Z_DIMS_AUTON)]
    target_params = init_mlp(mkeys[-1], Z_DIM, HIDDEN, Z_DIM)

    slab = pack_params(auton_params, target_params)

    out = jax.block_until_ready(skew_product_forward(z, slab))
    ref = reference_forward(z, auton_params, target_params)

    assert out.shape == (BATCH, Z_DIM)
    assert bool(jnp.all(jnp.isfinite(out)))
    # bf16 weights/activations on the MXU vs. f32 reference -> relaxed tolerance
    max_err = float(jnp.max(jnp.abs(out - ref)))
    assert jnp.allclose(out, ref, atol=2e-2, rtol=2e-2), max_err
    print("KERNEL_OK")
</pallas_src>

<mosaic_0001>
module attributes {stable_mosaic.version = 11 : i64} {
  func.func @_skew_kernel(%arg0: i32, %arg1: memref<8x32xf32, #tpu.memory_space<vmem>>, %arg2: memref<104x128xbf16, #tpu.memory_space<vmem>>, %arg3: memref<8x32xf32, #tpu.memory_space<vmem>>) attributes {dimension_semantics = [#tpu.dimension_semantics<parallel>], iteration_bounds = array<i64: 8>, scalar_prefetch = 0 : i64, scratch_operands = 0 : i64, tpu.core_type = #tpu.core_type<tc>, window_params = [{transform_indices = @transform_0, window_bounds = array<i64: 8, 32>}, {pipeline_mode = #tpu.pipeline_mode<synchronous>, transform_indices = @transform_1, window_bounds = array<i64: 104, 128>}, {transform_indices = @transform_2, window_bounds = array<i64: 8, 32>}]} {
    %c0 = arith.constant 0 : index
    %c0_0 = arith.constant 0 : index
    %0 = vector.load %arg1[%c0, %c0_0] : memref<8x32xf32, #tpu.memory_space<vmem>>, vector<8x32xf32>
    %1 = arith.truncf %0 : vector<8x32xf32> to vector<8x32xbf16>
    %c0_1 = arith.constant 0 : index
    %c0_2 = arith.constant 0 : index
    %2 = vector.load %arg2[%c0_1, %c0_2] : memref<104x128xbf16, #tpu.memory_space<vmem>>, vector<32x96xbf16>
    %c0_3 = arith.constant 0 : index
    %c96 = arith.constant 96 : index
    %3 = vector.load %arg2[%c0_3, %c96] : memref<104x128xbf16, #tpu.memory_space<vmem>>, vector<32x16xbf16>
    %c32 = arith.constant 32 : index
    %c0_4 = arith.constant 0 : index
    %4 = vector.load %arg2[%c32, %c0_4] : memref<104x128xbf16, #tpu.memory_space<vmem>>, vector<64x48xbf16>
    %c96_5 = arith.constant 96 : index
    %c0_6 = arith.constant 0 : index
    %5 = vector.load %arg2[%c96_5, %c0_6] : memref<104x128xbf16, #tpu.memory_space<vmem>>, vector<8x128xbf16>
    %6 = arith.extf %5 : vector<8x128xbf16> to vector<8x128xf32>
    %cst = arith.constant dense<0.000000e+00> : vector<8x96xf32>
    %7 = tpu.matmul %1, %2, %cst {dimension_numbers = #tpu.dot_dimension_numbers<[1], [0], [0], [1], [0, 0, 1, 1], [], []>} : vector<8x32xbf16>, vector<32x96xbf16>, vector<8x96xf32> -> vector<8x96xf32>
    %8 = vector.extract_strided_slice %6 {offsets = [0, 0], sizes = [8, 96], strides = [1, 1]} : vector<8x128xf32> to vector<8x96xf32>
    %9 = arith.addf %7, %8 : vector<8x96xf32>
    %10 = vector.extract_strided_slice %9 {offsets = [0, 0], sizes = [8, 64], strides = [1, 1]} : vector<8x96xf32> to vector<8x64xf32>
    %11 = math.tanh %10 : vector<8x64xf32>
    %12 = arith.truncf %11 : vector<8x64xf32> to vector<8x64xbf16>
    %cst_7 = arith.constant dense<0.000000e+00> : vector<8x48xf32>
    %13 = tpu.matmul %12, %4, %cst_7 {dimension_numbers = #tpu.dot_dimension_numbers<[1], [0], [0], [1], [0, 0, 1, 1], [], []>} : vector<8x64xbf16>, vector<64x48xbf16>, vector<8x48xf32> -> vector<8x48xf32>
    %14 = vector.extract_strided_slice %13 {offsets = [0, 16], sizes = [8, 32], strides = [1, 1]} : vector<8x48xf32> to vector<8x32xf32>
    %15 = vector.extract_strided_slice %9 {offsets = [0, 64], sizes = [8, 32], strides = [1, 1]} : vector<8x96xf32> to vector<8x32xf32>
    %16 = arith.addf %14, %15 : vector<8x32xf32>
    %17 = math.tanh %16 : vector<8x32xf32>
    %18 = arith.truncf %17 : vector<8x32xf32> to vector<8x32xbf16>
    %cst_8 = arith.constant dense<0.000000e+00> : vector<8x16xf32>
    %19 = tpu.matmul %18, %3, %cst_8 {dimension_numbers = #tpu.dot_dimension_numbers<[1], [0], [0], [1], [0, 0, 1, 1], [], []>} : vector<8x32xbf16>, vector<32x16xbf16>, vector<8x16xf32> -> vector<8x16xf32>
    %20 = vector.extract_strided_slice %13 {offsets = [0, 0], sizes = [8, 16], strides = [1, 1]} : vector<8x48xf32> to vector<8x16xf32>
    %21 = tpu.concatenate %20, %19 in 1 : vector<8x16xf32>, vector<8x16xf32> -> vector<8x32xf32>
    %22 = vector.extract_strided_slice %6 {offsets = [0, 96], sizes = [8, 32], strides = [1, 1]} : vector<8x128xf32> to vector<8x32xf32>
    %23 = arith.addf %21, %22 : vector<8x32xf32>
    %c0_9 = arith.constant 0 : index
    %c0_10 = arith.constant 0 : index
    %24 = vector.load %arg3[%c0_9, %c0_10] : memref<8x32xf32, #tpu.memory_space<vmem>>, vector<8x32xf32>
    tpu.vector_store %arg3[%c0_9, %c0_10], %23 {strides = array<i32>} : memref<8x32xf32, #tpu.memory_space<vmem>>, vector<8x32xf32>,
    return
  }
  func.func @transform_0(%arg0: i32) -> (i32, i32) {
    %c0_i32 = arith.constant 0 : i32
    %c0_i32_0 = arith.constant 0 : i32
    return %arg0, %c0_i32 : i32, i32
  }
  func.func @transform_1(%arg0: i32) -> (i32, i32) {
    %c0_i32 = arith.constant 0 : i32
    %c0_i32_0 = arith.constant 0 : i32
    %c0_i32_1 = arith.constant 0 : i32
    return %c0_i32, %c0_i32_0 : i32, i32
  }
  func.func @transform_2(%arg0: i32) -> (i32, i32) {
    %c0_i32 = arith.constant 0 : i32
    %c0_i32_0 = arith.constant 0 : i32
    return %arg0, %c0_i32 : i32, i32
  }
}

</mosaic_0001>

<bundles_post_ra>
// kernel: tpu_custom_call.1
= control target key start
LH: loop header
LB: loop body
LE: loop exit
PB: predicated region body
PF: predicated region fallthrough
CT: control target
= control target key end

     0   :  { %s516_s9 = smov 0   ;;  %s564_s0 = inlined_call_operand.vmem [shape: f32[64,32], index: 0, kind: input, shape index: {}]   ;;  %s565_s1 = inlined_call_operand.vmem [shape: bf16[104,128], index: 1, kind: input, shape index: {}]   ;;  %s566_s2 = inlined_call_operand.vmem [shape: f32[64,32], index: 2, kind: output, shape index: {}]  }
   0x1 LB: > { %s406_s10 = sadd.s32 4294967295, %s493_s9   ;;  %p410_p0 = scmp.ge.s32.totalorder %s493_s9, 1  ;;  %s493_s9 = sphi %s516_s9, %s12_s9  }
   0x2   : > { %p111_p1 = scmp.lt.s32.totalorder %s493_s9, 9 }
   0x4   : > { %p112_p2 = pnand %p410_p0, %p111_p1 }
   0x5   : > { %v477_v0 = vld [vmem:[%s565_s1] sm:$0xff] (!%p112_p2)   ;;  %v495_v1 = vmov (!%p112_p2), 0.0   ;;  %v478_v2 = vld [vmem:[%s565_s1 + $0x8] sm:$0xff] (!%p112_p2)   ;;  %vm496_vm0 = vmmov (!%p112_p2), 0   ;;  %p131_p3 = scmp.lt.s32.totalorder (!%p112_p2), %s406_s10, 7  ;;  %vm168_vm1 = vcmask (!%p112_p2), 261120  }
   0x6   : > { %115 = sbr.rel (%p112_p2) target bundleno = 919 (0x397), region = 28  ;;  %435 = vmatprep.subr.bf16.mxu0 (!%p112_p2), %v495_v1  ;;  %443 = vmatprep.subr.bf16.mxu1 (!%p112_p2), %v495_v1  ;;  %v479_v5 = vld [vmem:[%s565_s1 + $0x10] sm:$0xff] (!%p112_p2)   ;;  %v480_v6 = vld [vmem:[%s565_s1 + $0x18] sm:$0xff] (!%p112_p2)   ;;  %v481_v7 = vld [vmem:[%s565_s1 + $0x20] sm:$0xff] (!%p112_p2)   ;;  %s497_s29 = smov (!%p112_p2), 80   ;;  %vm238_vm2 = vcmask (!%p112_p2), 523264  }
   0x7   : > { %436 = vmatpush3.bf16.msra.mxu0 (!%p112_p2), %v477_v0  ;;  %439 = vmatprep.mubr.msk.bf16.mxu0 (!%p112_p2), %vm496_vm0, %v495_v1  ;;  %v482_v8 = vld [vmem:[%s565_s1 + $0x28] sm:$0xff] (!%p112_p2)   ;;  %v154_v9 = vld [vmem:[%s565_s1 + $0x30] sm:$0xf] (!%p112_p2)  ;;  %s498_s30 = smov (!%p112_p2), 32   ;;  %s499_s3 = smov (!%p112_p2), 112   ;;  %vm345_vm3 = vcmask (!%p112_p2), 130048  }
   0x8   : > { %437 = vmatprep.subr.bf16.mxu0 (!%p112_p2), %v495_v1  ;;  %451 = vmatprep.mubr.msk.bf16.mxu1 (!%p112_p2), %vm496_vm0, %v495_v1  ;;  %v155_v10 = vunpack.c.l.bf16 (!%p112_p2), %v154_v9  ;;  %s500_s4 = smov (!%p112_p2), 16  }
   0x9   : > { %444 = vmatpush3.bf16.msra.mxu1 (!%p112_p2), %v479_v5  ;;  %294 = vrot.lane.b32.xlu1 (!%p112_p2), %v478_v2, %s498_s30 }
   0xa   : > { %445 = vmatprep.subr.bf16.mxu1 (!%p112_p2), %v495_v1 }
   0xb   : > { %438 = vmatpush3.bf16.msra.mxu0 (!%p112_p2), %v478_v2 }
   0xc   : > { %455 = vmatprep.subr.bf16.mxu0 (!%p112_p2), %v495_v1 }
   0xd   : > { %s568_s10 = smov (!%p131_p3, %s406_s10), 7  ;;  %446 = vmatpush3.bf16.msra.mxu1 %v480_v6 }
   0xe   : > { %s411_s15 = sshll.u32 %s568_s10, 3  ;;  %447 = vmatprep.subr.bf16.mxu1 %v495_v1 }
   0xf   : > { %s134_s18 = scalar_lea.vmem %s564_s0, %s411_s15  ;;  %s138_s7 = scalar_lea.vmem %s566_s2, %s411_s15 }
  0x10   : > { %v140_v3 = vld [vmem:[%s134_s18] sm:$0xff] }
  0x11   : > { %v141_v4 = vpack.c.bf16 %v140_v3, %v140_v3  ;;  %448 = vmatpush3.bf16.msra.mxu1 %v481_v7 }
  0x12   : > { %449 = vmatprep.subr.bf16.mxu1 %v495_v1 }
  0x13   : > { %440 = vmatmul.mubr.msk.bf16.vlgmr.msra.gmra.mrb[0].mxu0 %vm168_vm1, %v141_v4 }
  0x14   : > { %459 = vmatprep.mubr.msk.bf16.mxu0 %vm496_vm0, %v495_v1 }
  0x15   : > { %450 = vmatpush3.bf16.msra.mxu1 %v482_v8 }
  0x7b   : > { %v295_v20 = vpop.permute.xlu1 %294 }
  0xe6   : > { %v206_v11 = vpop.f32.mrb[0].mxu0 }
  0xe7   : > { %v207_v12 = vadd.f32 %v206_v11, %v155_v10  ;;  %v441_v13 = vpop.f32.mrb[1].mxu0 }
  0xe8   : > { %v209_v14 = vpop.f32.mrb[2].mxu0 }
  0xe9   : > { %483 = vtanh.f32 %v207_v12  ;;  %283 = vrot.lane.b32.xlu0 %v207_v12, %s497_s29  ;;  %v442_v15 = vpop.f32.mrb[3].mxu0 }
  0xed   : > { %292 = vrot.lane.b32.xlu0 %v477_v0, %s498_s30 }
  0xf3   : > { %v484_v16 = vpop.eup %483 }
  0xf4   : > { %v213_v17 = vpack.c.bf16 %v484_v16, %v484_v16 }
  0xf6   : > { %452 = vmatmul.mubr.msk.bf16.vlgmr.msra.gmra.mrb[0].mxu1 %vm238_vm2, %v213_v17 }
 0x15b   : > { %v284_v18 = vpop.permute.xlu0 %283 }
 0x15f   : > { %v293_v19 = vpop.permute.xlu0 %292 }
 0x160   : > { %456 = vmatpush3.bf16.msra.mxu0 %v293_v19 }
 0x161   : > { %457 = vmatprep.subr.bf16.mxu0 %v495_v1 }
 0x164   : > { %458 = vmatpush3.bf16.msra.mxu0 %v295_v20 }
 0x1c9   : > { %v276_v21 = vpop.f32.mrb[0].mxu1 }
 0x1ca   : > { %v286_v22 = vadd.f32 %v284_v18, %v276_v21  ;;  %v453_v23 = vpop.f32.mrb[1].mxu1 }
 0x1cb   : > { %v279_v24 = vpop.f32.mrb[2].mxu1 }
 0x1cc   : > { %485 = vtanh.f32 %v286_v22  ;;  %v454_v25 = vpop.f32.mrb[3].mxu1 }
 0x1d6   : > { %v486_v26 = vpop.eup %485 }
 0x1d7   : > { %v288_v27 = vpack.c.bf16 %v486_v26, %v486_v26 }
 0x1d9   : > { %290 = vrot.lane.b32.xlu1 %v288_v27, %s499_s3 }
 0x1dd   : > { %348 = vrot.lane.b32.xlu1 %v155_v10, %s498_s30 }
 0x24b   : > { %v291_v28 = vpop.permute.xlu1 %290 }
 0x24c   : > { %460 = vmatmul.mubr.msk.bf16.vlgmr.msra.gmra.mrb[4].mxu0 %vm168_vm1, %v291_v28 }
 0x24f   : > { %v349_v33 = vpop.permute.xlu1 %348 }
 0x31f   : > { %v335_v29 = vpop.f32.mrb[4].mxu0 }
 0x320   : > { %342 = vrot.lane.b32.xlu0 %v335_v29, %s500_s4  ;;  %v461_v30 = vpop.f32.mrb[5].mxu0 }
 0x321   : > { %v338_v31 = vpop.f32.mrb[6].mxu0 }
 0x322   : > { %v462_v32 = vpop.f32.mrb[7].mxu0 }
 0x392   : > { %v343_v34 = vpop.permute.xlu0 %342 }
 0x393   : > { %v346_v35 = vsel %vm345_vm3, %v276_v21, %v343_v34 }
 0x394   : > { %v351_v36 = vadd.f32 %v349_v33, %v346_v35 }
 0x396   : > { %352 = vst.msk [vmem:[%s138_s7] sm:$0xff] %vm168_vm1, %v351_v36 }
 0x397 PF: > { %s12_s9 = sadd.s32 1, %s493_s9  }
 0x398   : > { %p9_p4 = scmp.ge.s32.totalorder %s12_s9, 10  }
 0x39a   :  { %11 = sbr.rel (!%p9_p4) target bundleno = 1 (0x1), region = 58 }

</bundles_post_ra>
